<compile_context>
chip_gen: v7x
topology: tpu7x:2x2x1
jax: 0.10.0
libtpu: 0.0.40
codegen_flags: <defaults>
</compile_context>

<pallas_src>
import functools

import numpy as np
import jax
import jax.numpy as jnp
from jax import lax
from jax.experimental import pallas as pl
from jax.experimental.pallas import tpu as pltpu

NEG_SLOPE = 0.01  # PyTorch nn.LeakyReLU default negative_slope


def _leaky(v):
    return jnp.where(v >= 0, v, NEG_SLOPE * v)


# ----------------------------- fused Pallas kernel -----------------------------------

def _make_fused_kernel(*, NB, T, s, Cin, Cout, J1, W, HLF, Lo, Lo_full, apply_act):
    CH = Cin
    SC = s * CH            # h phase-slab lane width      (256 for this config)
    SO = s * Cout          # output phase-slab lane width (128 for this config)

    def kernel(x_ref, w1_ref, b1_ref, w2_ref, b2_ref, out_ref, hp_ref):
        # ---- stage 1: shared stride-s transposed conv (branch1 + branch2a), polyphase ----
        x = x_ref[...]                                                 # (NB, Lx, Cin) bf16
        xcat = jnp.concatenate([x[:, j:j + T, :] for j in range(J1)], axis=-1)
        xcat = xcat.reshape(NB * T, J1 * Cin)                          # 128-deep contraction
        y1 = jnp.dot(xcat, w1_ref[...], preferred_element_type=jnp.float32)
        y1 = y1 + b1_ref[...]                                          # (NB*T, s*(CH+Cout))
        if apply_act:
            y1 = _leaky(y1)

        # column layout: [ s phases x CH  (branch2a -> h) | s phases x Cout (branch1) ]
        h = y1[:, :SC].reshape(NB, T, SC)        # stays in the lane-dense phase slab
        x1 = y1[:, SC:]                          # branch1 output slab, (NB*T, SO)

        if Lo < Lo_full:                         # mask stage-1 tail positions >= Lo
            lane = lax.broadcasted_iota(jnp.int32, (1, 1, SC), 2)
            frame = lax.broadcasted_iota(jnp.int32, (1, T, 1), 1)
            keep = (frame < T - 1) | (lane < (Lo - (T - 1) * s) * CH)
            h = jnp.where(keep, h, 0.0)

        # ---- haloed phase slab: zero ONLY the halo frames, then store the body ----------
        if HLF > 0:
            hp_ref[:, :HLF, :] = jnp.zeros((NB, HLF, SC), jnp.float32)
        if W - 1 - HLF > 0:
            hp_ref[:, HLF + T:, :] = jnp.zeros((NB, W - 1 - HLF, SC), jnp.float32)
        hp_ref[:, HLF:HLF + T, :] = h

        # ---- stage 2: dilated stride-1 transposed conv, phase-blocked -------------------
        # x2_slab[t] = sum_u hp[t+u] @ w2_block[u]; each dot is 256-deep x 128-wide.
        def tap_dot(u):
            lhs = hp_ref[:, u:u + T, :].reshape(NB * T, SC).astype(jnp.bfloat16)
            return jnp.dot(lhs, w2_ref[u * SC:(u + 1) * SC, :],
                           preferred_element_type=jnp.float32)

        x2 = b2_ref[...] + tap_dot(0)
        for u in range(1, W):
            x2 = x2 + tap_dot(u)
        if apply_act:
            x2 = _leaky(x2)

        # residual add (branch1 + branch2) and lane-dense (128-wide) slab store
        out_ref[...] = (x2 + x1).reshape(NB, T, SO).astype(out_ref.dtype)

    return kernel


# ----------------------------- module factory (folds weights once) -------------------

def make_transposed_dilation_block(params, *, kernel_size, stride, dilation, activation):
    """Fold the three ConvTranspose1d weights once (host side) and return a jittable fwd."""
    K, s, d = kernel_size, stride, dilation
    Cin, Cout, _ = np.asarray(params["b1_w"]).shape
    CH = Cin
    apply_act = activation is not None

    pad1 = (K - 1) // 2                      # stride-s convs: padding = output_padding
    p2 = (d * (K - 1)) // 2                  # dilated conv padding
    assert d * (K - 1) == 2 * p2, "dilated stage must preserve length for the residual add"

    # stage-1 polyphase tap schedule: out[t*s + r] += x[t + j] @ W[:, :, kk]
    taps, jmax = [], 0
    for r in range(s):
        for kk in range(K):
            if (r + pad1 - kk) % s == 0:
                j = (r + pad1 - kk) // s
                assert j >= 0, "unsupported (kernel_size, stride) combination"
                taps.append((r, j, kk))
                jmax = max(jmax, j)
    J1 = jmax + 1

    # stage-2 phase-block schedule: out[t*s + ro] += h[(t+f)*s + ri] @ W2[:, :, k]
    sched = []
    for ro in range(s):
        for k in range(K):
            delta = ro + p2 - d * k
            f = delta // s
            ri = delta - f * s
            sched.append((ro, k, f, ri))
    f_lo = min(f for _, _, f, _ in sched)
    f_hi = max(f for _, _, f, _ in sched)
    W = f_hi - f_lo + 1                      # h frame-window width
    HLF = -f_lo                              # left (zero) halo frames

    # ---- fold weights with numpy, once per parameter set (NOT inside jit) ---------------
    b1_w = np.asarray(params["b1_w"], np.float32)     # (Cin, Cout, K)
    b1_b = np.asarray(params["b1_b"], np.float32)
    b2a_w = np.asarray(params["b2a_w"], np.float32)   # (Cin, Cin, K)
    b2a_b = np.asarray(params["b2a_b"], np.float32)
    b2b_w = np.asarray(params["b2b_w"], np.float32)   # (Cin, Cout, K)
    b2b_b = np.asarray(params["b2b_b"], np.float32)

    SC, SO = s * CH, s * Cout
    w1 = np.zeros((J1 * Cin, s * (CH + Cout)), np.float32)
    for r, j, kk in taps:
        w1[j * Cin:(j + 1) * Cin, r * CH:(r + 1) * CH] = b2a_w[:, :, kk]
        w1[j * Cin:(j + 1) * Cin, SC + r * Cout:SC + (r + 1) * Cout] = b1_w[:, :, kk]
    b1 = np.concatenate([np.tile(b2a_b, s), np.tile(b1_b, s)]).reshape(1, s * (CH + Cout))

    w2 = np.zeros((W * SC, SO), np.float32)            # block-structured, zero-padded
    for ro, k, f, ri in sched:
        u = f - f_lo
        w2[u * SC + ri * CH:u * SC + (ri + 1) * CH, ro * Cout:(ro + 1) * Cout] = b2b_w[:, :, k]
    b2 = np.tile(b2b_b, s).reshape(1, SO)

    folded = dict(w1=jnp.asarray(w1, jnp.bfloat16), b1=jnp.asarray(b1, jnp.float32),
                  w2=jnp.asarray(w2, jnp.bfloat16), b2=jnp.asarray(b2, jnp.float32))

    def forward(x_ncl, folded=folded):
        N, cin_, L = x_ncl.shape
        assert cin_ == Cin
        Lo = (L - 1) * s + (K - 1) - pad1 + 1        # stage-1 (= final) length
        T = -(-Lo // s)                              # phase frames
        Lo_full = T * s
        Lx = max(L, T + jmax)                        # shift-padded compact input frames
        TP = T + W - 1                               # haloed h frames

        # batch blocking: <= 1024 matmul rows per step, but prefer >= 2 grid steps so the
        # pipeline double-buffers and both v7x TensorCores get work.
        cands = [c for c in range(1, N + 1) if N % c == 0 and c * T <= max(T, 1024)]
        multi = [c for c in cands if N // c >= 2]
        NB = max(multi) if multi else max(cands)

        x = jnp.transpose(x_ncl, (0, 2, 1)).astype(jnp.bfloat16)     # NCL -> NLC, bf16 DMA
        x = jnp.pad(x, ((0, 0), (0, Lx - L), (0, 0)))                # tiny shift pad only

        kernel = _make_fused_kernel(NB=NB, T=T, s=s, Cin=Cin, Cout=Cout, J1=J1, W=W,
                                    HLF=HLF, Lo=Lo, Lo_full=Lo_full, apply_act=apply_act)

        out_slab = pl.pallas_call(
            kernel,
            out_shape=jax.ShapeDtypeStruct((N, T, SO), x_ncl.dtype),
            grid_spec=pltpu.PrefetchScalarGridSpec(
                num_scalar_prefetch=0,
                grid=(N // NB,),
                in_specs=[
                    pl.BlockSpec((NB, Lx, Cin), lambda n: (n, 0, 0)),            # input
                    pl.BlockSpec((J1 * Cin, s * (CH + Cout)), lambda n: (0, 0)),  # w1
                    pl.BlockSpec((1, s * (CH + Cout)), lambda n: (0, 0)),         # b1
                    pl.BlockSpec((W * SC, SO), lambda n: (0, 0)),                 # w2 (blocked)
                    pl.BlockSpec((1, SO), lambda n: (0, 0)),                      # b2
                ],
                out_specs=pl.BlockSpec((NB, T, SO), lambda n: (n, 0, 0)),
                scratch_shapes=[pltpu.VMEM((NB, TP, SC), jnp.float32)],           # haloed h
            ),
            compiler_params=pltpu.CompilerParams(dimension_semantics=("parallel",)),
        )(x, folded["w1"], folded["b1"], folded["w2"], folded["b2"])

        # slab -> (N, Lo, Cout) is a row-major-contiguous (free) reshape; then NLC -> NCL
        out = out_slab.reshape(N, Lo_full, Cout)[:, :Lo, :]
        return jnp.transpose(out, (0, 2, 1))

    return forward


# ----------------------------- plain-JAX reference -----------------------------------

def _convT_ref(x_ncl, weight, bias, stride, padding, output_padding, dilation):
    Cin, Cout, K = weight.shape
    wf = jnp.transpose(weight, (1, 0, 2))[:, :, ::-1]
    pad_l = dilation * (K - 1) - padding
    pad_r = dilation * (K - 1) - padding + output_padding
    y = jax.lax.conv_general_dilated(
        x_ncl, wf, window_strides=(1,), padding=[(pad_l, pad_r)],
        lhs_dilation=(stride,), rhs_dilation=(dilation,),
        dimension_numbers=("NCH", "OIH", "NCH"))
    return y + bias[None, :, None]


def _block_ref(x_ncl, params, *, kernel_size, stride, dilation, activation):
    K = kernel_size
    pad = (K - 1) // 2
    p2 = (dilation * (K - 1)) // 2
    act = _leaky if activation is not None else (lambda v: v)
    x1 = act(_convT_ref(x_ncl, params["b1_w"], params["b1_b"], stride, pad, pad, 1))
    h = act(_convT_ref(x_ncl, params["b2a_w"], params["b2a_b"], stride, pad, pad, 1))
    x2 = act(_convT_ref(h, params["b2b_w"], params["b2b_b"], 1, p2, 0, dilation))
    return x1 + x2


# ----------------------------------- main ---------------------------------------------

if __name__ == "__main__":
    # Small shapes consistent with the module's usage inside AudioDecoder.
    N, Cin, L = 2, 64, 8
    Cout, K, stride, dilation = 32, 7, 4, 2   # TransposedDilationBlock needs dilation > 0
    activation = "LeakyReLU"

    key = jax.random.PRNGKey(0)
    k = jax.random.split(key, 7)
    params = {
        # PyTorch ConvTranspose1d weight layout: (in_channels, out_channels, kernel_size)
        "b1_w": 0.1 * jax.random.normal(k[0], (Cin, Cout, K), jnp.float32),
        "b1_b": 0.1 * jax.random.normal(k[1], (Cout,), jnp.float32),
        "b2a_w": 0.1 * jax.random.normal(k[2], (Cin, Cin, K), jnp.float32),
        "b2a_b": 0.1 * jax.random.normal(k[3], (Cin,), jnp.float32),
        "b2b_w": 0.1 * jax.random.normal(k[4], (Cin, Cout, K), jnp.float32),
        "b2b_b": 0.1 * jax.random.normal(k[5], (Cout,), jnp.float32),
    }
    x = jax.random.normal(k[6], (N, Cin, L), jnp.float32)     # NCL, like PyTorch

    # weight folding happens here, once, outside the jitted forward
    fwd = jax.jit(make_transposed_dilation_block(
        params, kernel_size=K, stride=stride, dilation=dilation, activation=activation))

    y = fwd(x)
    jax.block_until_ready(y)

    y_ref = _block_ref(x, params, kernel_size=K, stride=stride,
                       dilation=dilation, activation=activation)
    assert y.shape == y_ref.shape, (y.shape, y_ref.shape)
    # bf16 MXU operands with f32 accumulation; well inside the 2e-2 tolerance
    assert jnp.allclose(y, y_ref, rtol=2e-2, atol=2e-2), float(jnp.max(jnp.abs(y - y_ref)))

    print("KERNEL_OK")
</pallas_src>

<mosaic_0001>
module attributes {stable_mosaic.version = 11 : i64} {
  func.func @kernel(%arg0: i32, %arg1: memref<1x9x64xbf16, #tpu.memory_space<vmem>>, %arg2: memref<128x384xbf16, #tpu.memory_space<vmem>>, %arg3: memref<1x384xf32, #tpu.memory_space<vmem>>, %arg4: memref<1280x128xbf16, #tpu.memory_space<vmem>>, %arg5: memref<1x128xf32, #tpu.memory_space<vmem>>, %arg6: memref<1x8x128xf32, #tpu.memory_space<vmem>>, %arg7: memref<1x12x256xf32, #tpu.memory_space<vmem>>) attributes {dimension_semantics = [#tpu.dimension_semantics<parallel>], iteration_bounds = array<i64: 2>, scalar_prefetch = 0 : i64, scratch_operands = 1 : i64, tpu.core_type = #tpu.core_type<tc>, window_params = [{transform_indices = @transform_0, window_bounds = array<i64: 1, 9, 64>}, {pipeline_mode = #tpu.pipeline_mode<synchronous>, transform_indices = @transform_1, window_bounds = array<i64: 128, 384>}, {pipeline_mode = #tpu.pipeline_mode<synchronous>, transform_indices = @transform_2, window_bounds = array<i64: 1, 384>}, {pipeline_mode = #tpu.pipeline_mode<synchronous>, transform_indices = @transform_3, window_bounds = array<i64: 1280, 128>}, {pipeline_mode = #tpu.pipeline_mode<synchronous>, transform_indices = @transform_4, window_bounds = array<i64: 1, 128>}, {transform_indices = @transform_5, window_bounds = array<i64: 1, 8, 128>}]} {
    %c0 = arith.constant 0 : index
    %c0_0 = arith.constant 0 : index
    %c0_1 = arith.constant 0 : index
    %0 = vector.load %arg1[%c0, %c0_0, %c0_1] : memref<1x9x64xbf16, #tpu.memory_space<vmem>>, vector<1x9x64xbf16>
    %1 = vector.extract_strided_slice %0 {offsets = [0, 0, 0], sizes = [1, 8, 64], strides = [1, 1, 1]} : vector<1x9x64xbf16> to vector<1x8x64xbf16>
    %2 = vector.extract_strided_slice %0 {offsets = [0, 1, 0], sizes = [1, 8, 64], strides = [1, 1, 1]} : vector<1x9x64xbf16> to vector<1x8x64xbf16>
    %3 = tpu.concatenate %1, %2 in 2 : vector<1x8x64xbf16>, vector<1x8x64xbf16> -> vector<1x8x128xbf16>
    %4 = vector.shape_cast %3 : vector<1x8x128xbf16> to vector<8x128xbf16>
    %c0_2 = arith.constant 0 : index
    %c0_3 = arith.constant 0 : index
    %5 = vector.load %arg2[%c0_2, %c0_3] : memref<128x384xbf16, #tpu.memory_space<vmem>>, vector<128x384xbf16>
    %cst = arith.constant dense<0.000000e+00> : vector<8x384xf32>
    %6 = tpu.matmul %4, %5, %cst {dimension_numbers = #tpu.dot_dimension_numbers<[1], [0], [0], [1], [0, 0, 1, 1], [], []>} : vector<8x128xbf16>, vector<128x384xbf16>, vector<8x384xf32> -> vector<8x384xf32>
    %c0_4 = arith.constant 0 : index
    %c0_5 = arith.constant 0 : index
    %7 = vector.load %arg3[%c0_4, %c0_5] : memref<1x384xf32, #tpu.memory_space<vmem>>, vector<1x384xf32>
    %8 = vector.broadcast %7 : vector<1x384xf32> to vector<8x384xf32>
    %9 = arith.addf %6, %8 : vector<8x384xf32>
    %cst_6 = arith.constant 0.000000e+00 : f32
    %10 = vector.broadcast %cst_6 : f32 to vector<8x384xf32>
    %11 = arith.cmpf oge, %9, %10 : vector<8x384xf32>
    %cst_7 = arith.constant 0.00999999977 : f32
    %12 = vector.broadcast %cst_7 : f32 to vector<8x384xf32>
    %13 = arith.mulf %12, %9 : vector<8x384xf32>
    %14 = arith.select %11, %9, %13 : vector<8x384xi1>, vector<8x384xf32>
    %15 = vector.extract_strided_slice %14 {offsets = [0, 0], sizes = [8, 256], strides = [1, 1]} : vector<8x384xf32> to vector<8x256xf32>
    %16 = vector.shape_cast %15 : vector<8x256xf32> to vector<1x8x256xf32>
    %17 = vector.extract_strided_slice %14 {offsets = [0, 256], sizes = [8, 128], strides = [1, 1]} : vector<8x384xf32> to vector<8x128xf32>
    %cst_8 = arith.constant 0.000000e+00 : f32
    %18 = vector.broadcast %cst_8 : f32 to vector<1x2x256xf32>
    %c0_9 = arith.constant 0 : index
    %c0_10 = arith.constant 0 : index
    %c0_11 = arith.constant 0 : index
    %19 = vector.load %arg7[%c0_9, %c0_10, %c0_11] : memref<1x12x256xf32, #tpu.memory_space<vmem>>, vector<1x2x256xf32>
    tpu.vector_store %arg7[%c0_9, %c0_10, %c0_11], %18 {strides = array<i32>} : memref<1x12x256xf32, #tpu.memory_space<vmem>>, vector<1x2x256xf32>,
    %cst_12 = arith.constant 0.000000e+00 : f32
    %20 = vector.broadcast %cst_12 : f32 to vector<1x2x256xf32>
    %c0_13 = arith.constant 0 : index
    %c10 = arith.constant 10 : index
    %c0_14 = arith.constant 0 : index
    %21 = vector.load %arg7[%c0_13, %c10, %c0_14] : memref<1x12x256xf32, #tpu.memory_space<vmem>>, vector<1x2x256xf32>
    tpu.vector_store %arg7[%c0_13, %c10, %c0_14], %20 {strides = array<i32>} : memref<1x12x256xf32, #tpu.memory_space<vmem>>, vector<1x2x256xf32>,
    %c0_15 = arith.constant 0 : index
    %c2 = arith.constant 2 : index
    %c0_16 = arith.constant 0 : index
    %22 = vector.load %arg7[%c0_15, %c2, %c0_16] : memref<1x12x256xf32, #tpu.memory_space<vmem>>, vector<1x8x256xf32>
    tpu.vector_store %arg7[%c0_15, %c2, %c0_16], %16 {strides = array<i32>} : memref<1x12x256xf32, #tpu.memory_space<vmem>>, vector<1x8x256xf32>,
    %c0_17 = arith.constant 0 : index
    %c0_18 = arith.constant 0 : index
    %23 = vector.load %arg5[%c0_17, %c0_18] : memref<1x128xf32, #tpu.memory_space<vmem>>, vector<1x128xf32>
    %c0_19 = arith.constant 0 : index
    %c0_20 = arith.constant 0 : index
    %c0_21 = arith.constant 0 : index
    %24 = vector.load %arg7[%c0_19, %c0_20, %c0_21] : memref<1x12x256xf32, #tpu.memory_space<vmem>>, vector<1x8x256xf32>
    %25 = vector.shape_cast %24 : vector<1x8x256xf32> to vector<8x256xf32>
    %26 = arith.truncf %25 : vector<8x256xf32> to vector<8x256xbf16>
    %c0_22 = arith.constant 0 : index
    %c0_23 = arith.constant 0 : index
    %27 = vector.load %arg4[%c0_22, %c0_23] : memref<1280x128xbf16, #tpu.memory_space<vmem>>, vector<256x128xbf16>
    %cst_24 = arith.constant dense<0.000000e+00> : vector<8x128xf32>
    %28 = tpu.matmul %26, %27, %cst_24 {dimension_numbers = #tpu.dot_dimension_numbers<[1], [0], [0], [1], [0, 0, 1, 1], [], []>} : vector<8x256xbf16>, vector<256x128xbf16>, vector<8x128xf32> -> vector<8x128xf32>
    %29 = vector.broadcast %23 : vector<1x128xf32> to vector<8x128xf32>
    %30 = arith.addf %29, %28 : vector<8x128xf32>
    %c0_25 = arith.constant 0 : index
    %c1 = arith.constant 1 : index
    %c0_26 = arith.constant 0 : index
    %31 = vector.load %arg7[%c0_25, %c1, %c0_26] : memref<1x12x256xf32, #tpu.memory_space<vmem>>, vector<1x8x256xf32>
    %32 = vector.shape_cast %31 : vector<1x8x256xf32> to vector<8x256xf32>
    %33 = arith.truncf %32 : vector<8x256xf32> to vector<8x256xbf16>
    %c256 = arith.constant 256 : index
    %c0_27 = arith.constant 0 : index
    %34 = vector.load %arg4[%c256, %c0_27] : memref<1280x128xbf16, #tpu.memory_space<vmem>>, vector<256x128xbf16>
    %cst_28 = arith.constant dense<0.000000e+00> : vector<8x128xf32>
    %35 = tpu.matmul %33, %34, %cst_28 {dimension_numbers = #tpu.dot_dimension_numbers<[1], [0], [0], [1], [0, 0, 1, 1], [], []>} : vector<8x256xbf16>, vector<256x128xbf16>, vector<8x128xf32> -> vector<8x128xf32>
    %36 = arith.addf %30, %35 : vector<8x128xf32>
    %c0_29 = arith.constant 0 : index
    %c2_30 = arith.constant 2 : index
    %c0_31 = arith.constant 0 : index
    %37 = vector.load %arg7[%c0_29, %c2_30, %c0_31] : memref<1x12x256xf32, #tpu.memory_space<vmem>>, vector<1x8x256xf32>
    %38 = vector.shape_cast %37 : vector<1x8x256xf32> to vector<8x256xf32>
    %39 = arith.truncf %38 : vector<8x256xf32> to vector<8x256xbf16>
    %c512 = arith.constant 512 : index
    %c0_32 = arith.constant 0 : index
    %40 = vector.load %arg4[%c512, %c0_32] : memref<1280x128xbf16, #tpu.memory_space<vmem>>, vector<256x128xbf16>
    %cst_33 = arith.constant dense<0.000000e+00> : vector<8x128xf32>
    %41 = tpu.matmul %39, %40, %cst_33 {dimension_numbers = #tpu.dot_dimension_numbers<[1], [0], [0], [1], [0, 0, 1, 1], [], []>} : vector<8x256xbf16>, vector<256x128xbf16>, vector<8x128xf32> -> vector<8x128xf32>
    %42 = arith.addf %36, %41 : vector<8x128xf32>
    %c0_34 = arith.constant 0 : index
    %c3 = arith.constant 3 : index
    %c0_35 = arith.constant 0 : index
    %43 = vector.load %arg7[%c0_34, %c3, %c0_35] : memref<1x12x256xf32, #tpu.memory_space<vmem>>, vector<1x8x256xf32>
    %44 = vector.shape_cast %43 : vector<1x8x256xf32> to vector<8x256xf32>
    %45 = arith.truncf %44 : vector<8x256xf32> to vector<8x256xbf16>
    %c768 = arith.constant 768 : index
    %c0_36 = arith.constant 0 : index
    %46 = vector.load %arg4[%c768, %c0_36] : memref<1280x128xbf16, #tpu.memory_space<vmem>>, vector<256x128xbf16>
    %cst_37 = arith.constant dense<0.000000e+00> : vector<8x128xf32>
    %47 = tpu.matmul %45, %46, %cst_37 {dimension_numbers = #tpu.dot_dimension_numbers<[1], [0], [0], [1], [0, 0, 1, 1], [], []>} : vector<8x256xbf16>, vector<256x128xbf16>, vector<8x128xf32> -> vector<8x128xf32>
    %48 = arith.addf %42, %47 : vector<8x128xf32>
    %c0_38 = arith.constant 0 : index
    %c4 = arith.constant 4 : index
    %c0_39 = arith.constant 0 : index
    %49 = vector.load %arg7[%c0_38, %c4, %c0_39] : memref<1x12x256xf32, #tpu.memory_space<vmem>>, vector<1x8x256xf32>
    %50 = vector.shape_cast %49 : vector<1x8x256xf32> to vector<8x256xf32>
    %51 = arith.truncf %50 : vector<8x256xf32> to vector<8x256xbf16>
    %c1024 = arith.constant 1024 : index
    %c0_40 = arith.constant 0 : index
    %52 = vector.load %arg4[%c1024, %c0_40] : memref<1280x128xbf16, #tpu.memory_space<vmem>>, vector<256x128xbf16>
    %cst_41 = arith.constant dense<0.000000e+00> : vector<8x128xf32>
    %53 = tpu.matmul %51, %52, %cst_41 {dimension_numbers = #tpu.dot_dimension_numbers<[1], [0], [0], [1], [0, 0, 1, 1], [], []>} : vector<8x256xbf16>, vector<256x128xbf16>, vector<8x128xf32> -> vector<8x128xf32>
    %54 = arith.addf %48, %53 : vector<8x128xf32>
    %cst_42 = arith.constant 0.000000e+00 : f32
    %55 = vector.broadcast %cst_42 : f32 to vector<8x128xf32>
    %56 = arith.cmpf oge, %54, %55 : vector<8x128xf32>
    %cst_43 = arith.constant 0.00999999977 : f32
    %57 = vector.broadcast %cst_43 : f32 to vector<8x128xf32>
    %58 = arith.mulf %57, %54 : vector<8x128xf32>
    %59 = arith.select %56, %54, %58 : vector<8x128xi1>, vector<8x128xf32>
    %60 = arith.addf %59, %17 : vector<8x128xf32>
    %61 = vector.shape_cast %60 : vector<8x128xf32> to vector<1x8x128xf32>
    %c0_44 = arith.constant 0 : index
    %c0_45 = arith.constant 0 : index
    %c0_46 = arith.constant 0 : index
    %62 = vector.load %arg6[%c0_44, %c0_45, %c0_46] : memref<1x8x128xf32, #tpu.memory_space<vmem>>, vector<1x8x128xf32>
    tpu.vector_store %arg6[%c0_44, %c0_45, %c0_46], %61 {strides = array<i32>} : memref<1x8x128xf32, #tpu.memory_space<vmem>>, vector<1x8x128xf32>,
    return
  }
  func.func @transform_0(%arg0: i32) -> (i32, i32, i32) {
    %c0_i32 = arith.constant 0 : i32
    %c0_i32_0 = arith.constant 0 : i32
    %c0_i32_1 = arith.constant 0 : i32
    return %arg0, %c0_i32, %c0_i32_0 : i32, i32, i32
  }
  func.func @transform_1(%arg0: i32) -> (i32, i32) {
    %c0_i32 = arith.constant 0 : i32
    %c0_i32_0 = arith.constant 0 : i32
    %c0_i32_1 = arith.constant 0 : i32
    return %c0_i32, %c0_i32_0 : i32, i32
  }
  func.func @transform_2(%arg0: i32) -> (i32, i32) {
    %c0_i32 = arith.constant 0 : i32
    %c0_i32_0 = arith.constant 0 : i32
    %c0_i32_1 = arith.constant 0 : i32
    return %c0_i32, %c0_i32_0 : i32, i32
  }
  func.func @transform_3(%arg0: i32) -> (i32, i32) {
    %c0_i32 = arith.constant 0 : i32
    %c0_i32_0 = arith.constant 0 : i32
    %c0_i32_1 = arith.constant 0 : i32
    return %c0_i32, %c0_i32_0 : i32, i32
  }
  func.func @transform_4(%arg0: i32) -> (i32, i32) {
    %c0_i32 = arith.constant 0 : i32
    %c0_i32_0 = arith.constant 0 : i32
    %c0_i32_1 = arith.constant 0 : i32
    return %c0_i32, %c0_i32_0 : i32, i32
  }
  func.func @transform_5(%arg0: i32) -> (i32, i32, i32) {
    %c0_i32 = arith.constant 0 : i32
    %c0_i32_0 = arith.constant 0 : i32
    %c0_i32_1 = arith.constant 0 : i32
    return %arg0, %c0_i32, %c0_i32_0 : i32, i32, i32
  }
}

</mosaic_0001>

<bundles_post_ra>
// kernel: forward.1
= control target key start
LH: loop header
LB: loop body
LE: loop exit
PB: predicated region body
PF: predicated region fallthrough
CT: control target
= control target key end

     0   :  { %10 = vsyncpa [#allocation4], 0  ;;  %s2010_s18 = smov 0   ;;  %s2181_s0 = inlined_call_operand.vmem [shape: bf16[2,9,64], index: 0, kind: input, shape index: {}]   ;;  %s2182_s1 = inlined_call_operand.vmem [shape: bf16[128,384], index: 1, kind: input, shape index: {}]   ;;  %s2183_s2 = inlined_call_operand.vmem [shape: f32[1,384], index: 2, kind: input, shape index: {}]   ;;  %s2184_s3 = inlined_call_operand.hbm [shape: bf16[1280,128], index: 3, kind: input, shape index: {}]   ;;  %s2185_s4 = inlined_call_operand.vmem [shape: f32[1,128], index: 4, kind: input, shape index: {}]   ;;  %s2186_s5 = inlined_call_operand.vmem [shape: f32[2,8,128], index: 5, kind: output, shape index: {}]  }
   0x1 LB: > { %s2016_s19 = sadd.s32 4294967295, %s1971_s18   ;;  %p1539_p0 = scmp.ge.s32.totalorder %s1971_s18, 1  ;;  %s1971_s18 = sphi %s2010_s18, %s16_s18  }
   0x2   : > { %p157_p1 = scmp.lt.s32.totalorder %s1971_s18, 3  ;;  %s1973_s20 = smov [#allocation3]  }
   0x3   : > { %s175_s21 = sshll.u32 %s1973_s20, 4  ;;  %p2187_p3 = scmp.eq.s32.totalorder %s2016_s19, 0  ;;  %s176_s21 = int_to_ptr.vmem [resolvable:$true] %s175_s21 }
   0x4   : > { %p2020_p2 = pnand %p1539_p0, %p157_p1  ;;  %s1933_s26 = scalar_lea.hbm %s2184_s3, 10240 }
   0x5   : > { %p1934_p6 = scmp.ne.s32.totalorder %s2184_s3, %s1933_s26  ;;  %p1940_p10 = scmp.lt.u32.totalorder %s1933_s26, %s2184_s3 }
   0x6   : > { %s2189_s22 = scalar_select %p2020_p2, 1, 0 }
   0x7   : > { %p1799_p4 = pneg %p2020_p2 }
   0x9   : > { %p2029_p5 = pnand %p2187_p3, %p1799_p4 }
   0xb   : > { %p1935_p7 = pneg %p2029_p5 }
   0xd   : > { %p1936_p8 = pnand %p1935_p7, %p1934_p6 }
   0xf   : > { %p1937_p9 = pneg %p1936_p8 }
  0x11   : > { %p1942_p11 = pnand %p1940_p10, %p1937_p9 }
  0x13   : > { %1945 = shalt.err (!%p1942_p11)
}
  0x14   : > { %s1946_s6 = scalar_lea.vmem %s176_s21, 10240  ;;  %p1954_p1 = scmp.lt.s32.totalorder %s176_s21, %s176_s21 }
  0x15   : > { %p1947_p12 = scmp.ne.s32.totalorder %s176_s21, %s1946_s6  ;;  %p1955_p4 = scmp.lt.s32.totalorder %s1946_s6, %s1946_s6 }
  0x17   : > { %p1949_p13 = pnand %p1947_p12, %p1935_p7  ;;  %p1956_p3 = por %p1955_p4, %p1954_p1 }
  0x19   : > { %p1950_p0 = pneg %p1949_p13 }
  0x1b   : > { %p1957_p2 = pnand %p1956_p3, %p1950_p0 }
  0x1d   : > { %1960 = shalt.err (!%p1957_p2)
}
  0x1e   : > { %s1974_s7 = smov 64   ;;  %s1975_s8 = smov 4  }
  0x1f   : > { %1802 = dma.hbm_to_vmem [thread:$0]  (!%p2029_p5), %s2184_s3, 10240, %s176_s21, [#allocation4], %s1974_s7, %s1974_s7, %s1975_s8  }
  0x20   : > { %p2191_p6 = scmp.ne.s32.totalorder %s2189_s22, 0 }
  0x21   : > { %p2192_p8 = scmp.eq.s32.totalorder (!%p2191_p6), %s2016_s19, 0 }
  0x22   : > { %202 = sbr.rel (%p2191_p6) target bundleno = 691 (0x2b3), region = 40 }
  0x29   : > { %1966 = dma.done.wait (%p2192_p8), [#allocation4], 10240   ;;  %p2193_p7 = pmov %p2192_p8 }
  0x2a   : > { %p229_p2 = scmp.lt.s32.totalorder %s2016_s19, 1  ;;  %v1976_v0 = vmov 0.0   ;;  %v1977_v1 = vmov 0   ;;  %vm1978_vm0 = vmmov 0   ;;  %v1821_v5 = vld [vmem:[%s2182_s1 + $0x4] ss:$12 sps:$4 sm:$0xff]  }
  0x2b   : > { %1968 = vsyncadd (%p2193_p7), [#allocation4], 4294957056  ;;  %1775 = vmatprep.subr.bf16.mxu1 %v1976_v0  ;;  %527 = vst [vmem:[#allocation2] sm:$0x3] %v1976_v0  ;;  %469 = vmatprep.mubr.bf16.mxu0 %v1977_v1  ;;  %v1823_v6 = vld [vmem:[%s2182_s1] ss:$12 sps:$4 sm:$0xff]  }
  0x2c   : > { %528 = vst [vmem:[#allocation2 + $0x8] sm:$0x3] %v1976_v0  ;;  %529 = vst [vmem:[#allocation2 + $0x10] sm:$0xc] %v1976_v0  ;;  %s2195_s19 = smov (!%p229_p2, %s2016_s19), 1  ;;  %1791 = vmatprep.mubr.msk.bf16.mxu1 %vm1978_vm0, %v1976_v0  ;;  %437 = vmatprep.subr.bf16.mxu0 %v1821_v5  ;;  %s1979_s10 = smov 64   ;;  %v294_v5 = vlaneseq }
  0x2d   : > { %530 = vst [vmem:[#allocation2 + $0x18] sm:$0xc] %v1976_v0  ;;  %s1655_s11 = sshll.u32 %s2195_s19, 3  ;;  %v1824_v7 = vld [vmem:[%s2182_s1 + $0x8] ss:$12 sps:$4 sm:$0xff]   ;;  %438 = vmatpush1.bf16.msra.mxu0 %v1823_v6  ;;  %v1853_v33 = vld [vmem:[#allocation3 + $0x40] sm:$0xff]  }
  0x2e   : > { %s233_s14 = scalar_lea.vmem %s2181_s0, %s1655_s11  ;;  %v1825_v10 = vld [vmem:[%s2182_s1 + $0x1c] ss:$12 sps:$4 sm:$0xff]   ;;  %1776 = vmatpush3.bf16.msra.mxu1 %v1824_v7  ;;  %v1827_v11 = vld [vmem:[%s2182_s1 + $0x18] ss:$12 sps:$4 sm:$0xff]   ;;  %v1828_v13 = vld [vmem:[%s2182_s1 + $0x20] ss:$12 sps:$4 sm:$0xff]   ;;  %s237_s28 = scalar_lea.vmem %s2186_s5, %s1655_s11 }
  0x2f   : > { %v2071_v2 = vld [vmem:[%s233_s14] sm:$0xf]  ;;  %v240_v3 = vld [vmem:[%s233_s14 + $0x4] sm:$0x1]  ;;  %439 = vmatprep.subr.bf16.mxu0 %v1825_v10  ;;  %1777 = vmatprep.subr.bf16.mxu1 %v1976_v0  ;;  %v1831_v16 = vld [vmem:[%s2182_s1 + $0x30] ss:$12 sps:$4 sm:$0xff]  }
  0x30   : > { %v1547_v4 = vcombine.low %v2071_v2, %v240_v3  ;;  %v1829_v14 = vld [vmem:[%s2182_s1 + $0x34] ss:$12 sps:$4 sm:$0xff]   ;;  %v1832_v17 = vld [vmem:[%s2182_s1 + $0x38] ss:$12 sps:$4 sm:$0xff]   ;;  %v1836_v20 = vld [vmem:[%s2182_s1 + $0x50] ss:$12 sps:$4 sm:$0xff]  }
  0x31   : > { %440 = vmatpush1.bf16.msra.mxu0 %v1827_v11  ;;  %v1833_v18 = vld [vmem:[%s2182_s1 + $0x4c] ss:$12 sps:$4 sm:$0xff]   ;;  %v1835_v19 = vld [vmem:[%s2182_s1 + $0x48] ss:$12 sps:$4 sm:$0xff]   ;;  %v1837_v21 = vld [vmem:[%s2182_s1 + $0x64] ss:$12 sps:$4 sm:$0xff]  }
  0x32   : > { %v247_v8 = vshrl.u32 %v1547_v4, 16  ;;  %v249_v9 = vshll.u32 %v1547_v4, 16  ;;  %1778 = vmatpush3.bf16.msra.mxu1 %v1828_v13  ;;  %441 = vmatprep.subr.bf16.mxu0 %v1829_v14  ;;  %v1839_v22 = vld [vmem:[%s2182_s1 + $0x60] ss:$12 sps:$4 sm:$0xff]   ;;  %v1840_v23 = vld [vmem:[%s2182_s1 + $0x68] ss:$12 sps:$4 sm:$0xff]  }
  0x33   : > { %1779 = vmatprep.subr.bf16.mxu1 %v1976_v0  ;;  %v1841_v24 = vld [vmem:[%s2182_s1 + $0x7c] ss:$12 sps:$4 sm:$0xff]   ;;  %v1843_v25 = vld [vmem:[%s2182_s1 + $0x78] ss:$12 sps:$4 sm:$0xff]   ;;  %v1844_v26 = vld [vmem:[%s2182_s1 + $0x80] ss:$12 sps:$4 sm:$0xff]  }
  0x34   : > { %v251_v12 = vrot.slane %v249_v9, 1  ;;  %v1845_v27 = vld [vmem:[%s2182_s1 + $0x94] ss:$12 sps:$4 sm:$0xff]   ;;  %v1847_v28 = vld [vmem:[%s2182_s1 + $0x90] ss:$12 sps:$4 sm:$0xff]   ;;  %vm255_vm1 = vcmask 523264  }
  0x35   : > { %442 = vmatpush1.bf16.msra.mxu0 %v1831_v16  ;;  %v1848_v29 = vld [vmem:[%s2182_s1 + $0x98] ss:$12 sps:$4 sm:$0xff]   ;;  %v1851_v31 = vld [vmem:[%s2182_s1 + $0xa8] ss:$12 sps:$4 sm:$0xff]   ;;  %v1852_v32 = vld [vmem:[%s2182_s1 + $0xb0] ss:$12 sps:$4 sm:$0xff]  }
  0x36   : > { %v252_v15 = vor.u32 %v251_v12, %v247_v8  ;;  %1780 = vmatpush3.bf16.msra.mxu1 %v1832_v17  ;;  %443 = vmatprep.subr.bf16.mxu0 %v1833_v18  ;;  %v1849_v30 = vld [vmem:[%s2182_s1 + $0xac] ss:$12 sps:$4 sm:$0xff]   ;;  %v1857_v34 = vld [vmem:[#allocation3 + $0xc0] sm:$0xff]   ;;  %v1859_v43 = vld [vmem:[#allocation3 + $0x50] sm:$0xff]   ;;  %v2154_v6 = vshrl.u32 %v294_v5, 7 }
  0x37   : > { %1781 = vmatprep.subr.bf16.mxu1 %v1976_v0  ;;  %v1854_v35 = vld [vmem:[#allocation3] sm:$0xff]   ;;  %v1855_v38 = vld [vmem:[#allocation3 + $0x48] sm:$0xff]   ;;  %v1860_v44 = vld [vmem:[#allocation3 + $0x10] sm:$0xff]  }
  0x38   : > { %253 = vrot.lane.b32.xlu0 %v252_v15, %s1979_s10  ;;  %v1858_v36 = vld [vmem:[#allocation3 + $0x80] sm:$0xff]   ;;  %v1861_v39 = vld [vmem:[#allocation3 + $0xc8] sm:$0xff]   ;;  %v1863_v45 = vld [vmem:[#allocation3 + $0x58] sm:$0xff]   ;;  %v296_v7 = vsub.s32 0, %v2154_v6  ;;  %v300_v9 = vsub.s32 1, %v2154_v6 }
  0x39   : > { %444 = vmatpush1.bf16.msra.mxu0 %v1835_v19  ;;  %v1856_v41 = vld [vmem:[#allocation3 + $0x8] sm:$0xff]   ;;  %v1864_v46 = vld [vmem:[#allocation3 + $0x18] sm:$0xff]   ;;  %v1865_v47 = vld [vmem:[#allocation3 + $0xd0] sm:$0xff]  }
  0x3a   : > { %1782 = vmatpush3.bf16.msra.mxu1 %v1836_v20  ;;  %445 = vmatprep.subr.bf16.mxu0 %v1837_v21  ;;  %v1862_v42 = vld [vmem:[#allocation3 + $0x88] sm:$0xff]   ;;  %v1866_v48 = vld [vmem:[#allocation3 + $0x90] sm:$0xff]   ;;  %v1867_v49 = vld [vmem:[#allocation3 + $0x60] sm:$0xff]  }
  0x3b   : > { %1783 = vmatprep.subr.bf16.mxu1 %v1976_v0  ;;  %v1868_v50 = vld [vmem:[#allocation3 + $0x20] sm:$0xff]   ;;  %v1869_v51 = vld [vmem:[#allocation3 + $0xd8] sm:$0xff]   ;;  %v1871_v53 = vld [vmem:[#allocation3 + $0x68] sm:$0xff]  }
  0x3c   : > { %v1870_v52 = vld [vmem:[#allocation3 + $0x98] sm:$0xff]   ;;  %v1872_v54 = vld [vmem:[#allocation3 + $0x28] sm:$0xff]   ;;  %v1873_v55 = vld [vmem:[#allocation3 + $0xe0] sm:$0xff]  }
  0x3d   : > { %446 = vmatpush1.bf16.msra.mxu0 %v1839_v22  ;;  %v1874_v56 = vld [vmem:[#allocation3 + $0xa0] sm:$0xff]   ;;  %v1875_v57 = vld [vmem:[#allocation3 + $0x70] sm:$0xff]   ;;  %v1877_v59 = vld [vmem:[#allocation3 + $0xe8] sm:$0xff]  }
  0x3e   : > { %1784 = vmatpush3.bf16.msra.mxu1 %v1840_v23  ;;  %447 = vmatprep.subr.bf16.mxu0 %v1841_v24  ;;  %v1876_v58 = vld [vmem:[#allocation3 + $0x30] sm:$0xff]   ;;  %v1879_v60 = vld [vmem:[#allocation3 + $0x78] sm:$0xff]   ;;  %v1878_v61 = vld [vmem:[#allocation3 + $0xa8] sm:$0xff]  }
  0x3f   : > { %1785 = vmatprep.subr.bf16.mxu1 %v1976_v0  ;;  %v1881_v62 = vld [vmem:[#allocation3 + $0xf0] sm:$0xff]   ;;  %v1880_v63 = vld [vmem:[#allocation3 + $0x38] sm:$0xff]   ;;  %v1883_v1 = vld [vmem:[#allocation3 + $0x140] sm:$0xff]  }
  0x40   : > { %v1886_v3 = vld [vmem:[#allocation3 + $0xb8] sm:$0xff]   ;;  %v1889_v4 = vld [vmem:[#allocation3 + $0x1c0] sm:$0xff]  }
  0x41   : > { %448 = vmatpush1.bf16.msra.mxu0 %v1843_v25  ;;  %v2160_v8 = vld [vmem:[%s2183_s2] sm:$0x7] }
  0x42   : > { %1786 = vmatpush3.bf16.msra.mxu1 %v1844_v26  ;;  %449 = vmatprep.subr.bf16.mxu0 %v1845_v27  ;;  %v297_v10 = vrot.slane %v2160_v8, %v296_v7  ;;  %v301_v11 = vrot.slane %v2160_v8, %v300_v9  ;;  %v1899_v5 = vld [vmem:[#allocation3 + $0x160] sm:$0xff]   ;;  %v1898_v7 = vld [vmem:[#allocation3 + $0x190] sm:$0xff]  }
  0x43   : > { %1787 = vmatprep.subr.bf16.mxu1 %v1976_v0  ;;  %v1900_v9 = vld [vmem:[#allocation3 + $0x120] sm:$0xff]  }
  0x45   : > { %450 = vmatpush1.bf16.msra.mxu0 %v1847_v28 }
  0x46   : > { %1788 = vmatpush3.bf16.msra.mxu1 %v1848_v29  ;;  %451 = vmatprep.subr.bf16.mxu0 %v1849_v30  ;;  %v1884_v29 = vld [vmem:[#allocation3 + $0x100] sm:$0xff]  }
  0x47   : > { %1789 = vmatprep.subr.bf16.mxu1 %v1976_v0  ;;  %v1882_v0 = vld [vmem:[#allocation3 + $0xb0] sm:$0xff]  }
  0x49   : > { %452 = vmatpush1.bf16.msra.mxu0 %v1851_v31 }
  0x4a   : > { %1790 = vmatpush3.bf16.msra.mxu1 %v1852_v32  ;;  %1665 = vmatprep.subr.bf16.mxu0 %v1853_v33 }
  0x4b   : > { %1687 = vmatprep.subr.bf16.mxu1 %v1857_v34 }
  0xaa   : > { %v254_v37 = vpop.permute.xlu0 %253 }
  0xab   : > { %v258_v40 = vsel %vm255_vm1, %v2071_v2, %v254_v37  ;;  %v1885_v2 = vld [vmem:[#allocation3 + $0xf8] sm:$0xff]  }
  0xac   : > { %470 = vmatmul.mubr.bf16.vlgmr.msra.gmra.mrb[0].mxu0 %v258_v40  ;;  %1792 = vmatmul.mubr.bf16.vlgmr.msra.gmra.mrb[0].mxu1 %v258_v40 }
  0xad   : > { %1666 = vmatpush3.bf16.msra.mxu0 %v1854_v35  ;;  %1688 = vmatpush3.bf16.msra.mxu1 %v1858_v36 }
  0xae   : > { %1667 = vmatprep.subr.bf16.mxu0 %v1855_v38  ;;  %1689 = vmatprep.subr.bf16.mxu1 %v1861_v39 }
  0xb1   : > { %1668 = vmatpush3.bf16.msra.mxu0 %v1856_v41  ;;  %1690 = vmatpush3.bf16.msra.mxu1 %v1862_v42  ;;  %v1887_v42 = vld [vmem:[#allocation3 + $0x148] sm:$0xff]  }
  0xb2   : > { %1669 = vmatprep.subr.bf16.mxu0 %v1859_v43  ;;  %1691 = vmatprep.subr.bf16.mxu1 %v1865_v47 }
  0xb5   : > { %1670 = vmatpush3.bf16.msra.mxu0 %v1860_v44  ;;  %1692 = vmatpush3.bf16.msra.mxu1 %v1866_v48 }
  0xb6   : > { %1671 = vmatprep.subr.bf16.mxu0 %v1863_v45  ;;  %1693 = vmatprep.subr.bf16.mxu1 %v1869_v51 }
  0xb9   : > { %1672 = vmatpush3.bf16.msra.mxu0 %v1864_v46  ;;  %1694 = vmatpush3.bf16.msra.mxu1 %v1870_v52 }
  0xba   : > { %1673 = vmatprep.subr.bf16.mxu0 %v1867_v49  ;;  %1695 = vmatprep.subr.bf16.mxu1 %v1873_v55  ;;  %v1888_v49 = vld [vmem:[#allocation3 + $0x108] sm:$0xff]   ;;  %v1891_v55 = vld [vmem:[#allocation3 + $0x150] sm:$0xff]  }
  0xbd   : > { %1674 = vmatpush3.bf16.msra.mxu0 %v1868_v50  ;;  %1696 = vmatpush3.bf16.msra.mxu1 %v1874_v56 }
  0xbe   : > { %1675 = vmatprep.subr.bf16.mxu0 %v1871_v53  ;;  %1697 = vmatprep.subr.bf16.mxu1 %v1877_v59 }
  0xc1   : > { %1676 = vmatpush3.bf16.msra.mxu0 %v1872_v54  ;;  %1698 = vmatpush3.bf16.msra.mxu1 %v1878_v61 }
  0xc2   : > { %1677 = vmatprep.subr.bf16.mxu0 %v1875_v57  ;;  %1699 = vmatprep.subr.bf16.mxu1 %v1881_v62  ;;  %v1892_v62 = vld [vmem:[#allocation3 + $0x110] sm:$0xff]  }
  0xc5   : > { %1678 = vmatpush3.bf16.msra.mxu0 %v1876_v58  ;;  %1700 = vmatpush3.bf16.msra.mxu1 %v1882_v0 }
  0xc6   : > { %1679 = vmatprep.subr.bf16.mxu0 %v1879_v60  ;;  %1701 = vmatprep.subr.bf16.mxu1 %v1885_v2  ;;  %v1890_v60 = vld [vmem:[#allocation3 + $0x180] sm:$0xff]   ;;  %v1894_v2 = vld [vmem:[#allocation3 + $0x188] sm:$0xff]  }
  0xc9   : > { %1680 = vmatpush3.bf16.msra.mxu0 %v1880_v63  ;;  %1702 = vmatpush3.bf16.msra.mxu1 %v1886_v3  ;;  %v1893_v63 = vld [vmem:[#allocation3 + $0x1c8] sm:$0xff]   ;;  %v1896_v3 = vld [vmem:[#allocation3 + $0x118] sm:$0xff]  }
  0xca   : > { %1709 = vmatprep.subr.bf16.mxu0 %v1883_v1  ;;  %1731 = vmatprep.subr.bf16.mxu1 %v1889_v4  ;;  %v1895_v1 = vld [vmem:[#allocation3 + $0x158] sm:$0xff]   ;;  %v1897_v4 = vld [vmem:[#allocation3 + $0x1d0] sm:$0xff]  }
 0x17f   : > { %v471_v12 = vpop.f32.mrb[0].mxu0  ;;  %v2165_v13 = vpop.f32.mrb[0].mxu1 }
 0x180   : > { %v472_v14 = vadd.f32 %v471_v12, %v297_v10  ;;  %v473_v15 = vpop.f32.mrb[1].mxu0  ;;  %v1793_v16 = vpop.f32.mrb[1].mxu1  ;;  %v1901_v10 = vld [vmem:[#allocation3 + $0x1d8] sm:$0xff]  }
 0x181   : > { %v474_v17 = vadd.f32 %v473_v15, %v301_v11  ;;  %v475_v18 = vpop.f32.mrb[2].mxu0  ;;  %v515_v19 = vpop.f32.mrb[2].mxu1  ;;  %v1903_v11 = vld [vmem:[#allocation3 + $0x168] sm:$0xff]   ;;  %v1902_v12 = vld [vmem:[#allocation3 + $0x198] sm:$0xff]   ;;  %v1905_v15 = vld [vmem:[#allocation3 + $0x1e0] sm:$0xff]  }
 0x182   : > { %vm518_vm2 = vcmp.ge.f32.partialorder %v472_v14, 0.0  ;;  %v521_v20 = vmul.f32 0.01, %v472_v14  ;;  %v476_v22 = vpop.f32.mrb[3].mxu0  ;;  %v1794_v23 = vpop.f32.mrb[3].mxu1  ;;  %v1907_v16 = vld [vmem:[#allocation3 + $0x170] sm:$0xff]  }
 0x183   : > { %vm519_vm3 = vcmp.ge.f32.partialorder %v474_v17, 0.0  ;;  %v522_v21 = vmul.f32 0.01, %v474_v17  ;;  %v1908_v18 = vld [vmem:[#allocation3 + $0x130] sm:$0xff]   ;;  %v1909_v19 = vld [vmem:[#allocation3 + $0x1e8] sm:$0xff]  }
 0x184   : > { %v524_v24 = vsel %vm518_vm2, %v472_v14, %v521_v20  ;;  %v1904_v14 = vld [vmem:[#allocation3 + $0x128] sm:$0xff]   ;;  %v1911_v20 = vld [vmem:[#allocation3 + $0x178] sm:$0xff]  }
 0x185   : > { %v533_v25 = vrot.slane %v524_v24, 6  ;;  %v525_v26 = vsel %vm519_vm3, %v474_v17, %v522_v21  ;;  %v1906_v17 = vld [vmem:[#allocation3 + $0x1a0] sm:$0xff]  }
 0x186   : > { %v534_v27 = vrot.slane %v525_v26, 6 }
 0x187   : > { %537 = vst [vmem:[#allocation2] sm:$0xfc] %v533_v25  ;;  %539 = vst [vmem:[#allocation2 + $0x10] sm:$0x3] %v533_v25  ;;  %v1910_v25 = vld [vmem:[#allocation3 + $0x1a8] sm:$0xff]  }
 0x188   : > { %538 = vst [vmem:[#allocation2 + $0x8] sm:$0xfc] %v534_v27  ;;  %540 = vst [vmem:[#allocation2 + $0x18] sm:$0x3] %v534_v27 }
 0x18e   : > { %v542_v28 = vld [vmem:[#allocation2] sm:$0xff]  ;;  %v723_v31 = vld [vmem:[#allocation2 + $0x10] sm:$0x1] }
 0x18f   : > { %v721_v30 = vld [vmem:[#allocation2] sm:$0xfe]  ;;  %v543_v32 = vld [vmem:[#allocation2 + $0x8] sm:$0xff]  ;;  %v915_v34 = vld [vmem:[#allocation2 + $0x18] sm:$0x3]  ;;  %v544_v41 = vpack.c.bf16 %v542_v28, %v542_v28 }
 0x190   : > { %v913_v33 = vld [vmem:[#allocation2 + $0x8] sm:$0xfc]  ;;  %v725_v35 = vpack.c.bf16 %v723_v31, %v721_v30  ;;  %v545_v36 = vpack.c.bf16 %v543_v32, %v543_v32  ;;  %v724_v39 = vld [vmem:[#allocation2 + $0x18] sm:$0x1]  ;;  %v1093_v21 = vld [vmem:[#allocation2] sm:$0xf8] }
 0x191   : > { %v917_v37 = vpack.c.bf16 %v915_v34, %v913_v33  ;;  %v722_v38 = vld [vmem:[#allocation2 + $0x8] sm:$0xfe]  ;;  %v1096_v45 = vld [vmem:[#allocation2 + $0x18] sm:$0x7]  ;;  %v1095_v22 = vld [vmem:[#allocation2 + $0x10] sm:$0x7] }
 0x192   : > { %v1094_v40 = vld [vmem:[#allocation2 + $0x8] sm:$0xf8]  ;;  %v726_v43 = vpack.c.bf16 %v724_v39, %v722_v38  ;;  %v762_v44 = vshll.u32 %v725_v35, 16  ;;  %706 = vmatprep.mubr.bf16.mxu0 %v545_v36  ;;  %v760_v56 = vshrl.u32 %v725_v35, 16  ;;  %v912_v23 = vld [vmem:[#allocation2] sm:$0xfc]  ;;  %v1097_v30 = vpack.c.bf16 %v1095_v22, %v1093_v21 }
 0x193   : > { %v953_v46 = vrot.slane %v917_v37, 1  ;;  %v1098_v47 = vpack.c.bf16 %v1096_v45, %v1094_v40  ;;  %707 = vmatmul.mubr.bf16.vlgmr.msra.gmra.mrb[4].mxu0 %v544_v41  ;;  %v914_v24 = vld [vmem:[#allocation2 + $0x10] sm:$0x3]  ;;  %v1287_v26 = vld [vmem:[#allocation2 + $0x8] sm:$0xf0]  ;;  %v1912_v28 = vld [vmem:[#allocation3 + $0x138] sm:$0xff]  }
 0x194   : > { %v769_v48 = vshll.u32 %v726_v43, 16  ;;  %1710 = vmatpush3.bf16.msra.mxu0 %v1884_v29  ;;  %v764_v50 = vrot.slane %v762_v44, 1  ;;  %v767_v53 = vshrl.u32 %v726_v43, 16  ;;  %v1289_v27 = vld [vmem:[#allocation2 + $0x18] sm:$0xf]  ;;  %v1913_v29 = vld [vmem:[#allocation3 + $0x1f0] sm:$0xff]   ;;  %v916_v31 = vpack.c.bf16 %v914_v24, %v912_v23 }
 0x195   : > { %1084 = vmatprep.mubr.bf16.mxu0 %v953_v46  ;;  %v1140_v51 = vshrl.u32 %v1098_v47, 16  ;;  %v1143_v52 = vshll.u32 %v1098_v47, 16  ;;  %1711 = vmatprep.subr.bf16.mxu0 %v1887_v42  ;;  %v1915_v32 = vld [vmem:[#allocation3 + $0x240] sm:$0xff]   ;;  %v1291_v33 = vpack.c.bf16 %v1289_v27, %v1287_v26  ;;  %v1914_v34 = vld [vmem:[#allocation3 + $0x1b0] sm:$0xff]   ;;  %v1132_v36 = vshrl.u32 %v1097_v30, 16  ;;  %v1917_v39 = vld [vmem:[#allocation3 + $0x1f8] sm:$0xff]  }
 0x196   : > { %v771_v54 = vrot.slane %v769_v48, 1  ;;  %v765_v61 = vor.u32 %v764_v50, %v760_v56  ;;  %v1916_v35 = vld [vmem:[#allocation3 + $0x200] sm:$0xff]   ;;  %v1135_v37 = vshll.u32 %v1097_v30, 16  ;;  %v952_v38 = vrot.slane %v916_v31, 1  ;;  %v1919_v40 = vld [vmem:[#allocation3 + $0x248] sm:$0xff]   ;;  %v1918_v42 = vld [vmem:[#allocation3 + $0x1b8] sm:$0xff]  }
 0x197   : > { %v1142_v57 = vrot.slane %v1140_v51, 1  ;;  %v1145_v58 = vrot.slane %v1143_v52, 2  ;;  %v1327_v41 = vrot.slane %v1291_v33, 2  ;;  %v1920_v43 = vld [vmem:[#allocation3 + $0x208] sm:$0xff]   ;;  %v1134_v44 = vrot.slane %v1132_v36, 1  ;;  %v1921_v46 = vld [vmem:[#allocation3 + $0x250] sm:$0xff]  }
 0x198   : > { %v772_v59 = vor.u32 %v771_v54, %v767_v53  ;;  %1712 = vmatpush3.bf16.msra.mxu0 %v1888_v49  ;;  %v1137_v45 = vrot.slane %v1135_v37, 2  ;;  %v1922_v48 = vld [vmem:[#allocation3 + $0x210] sm:$0xff]   ;;  %v1923_v49 = vld [vmem:[#allocation3 + $0x258] sm:$0xff]   ;;  %v1925_v51 = vld [vmem:[#allocation3 + $0x260] sm:$0xff]   ;;  %v304_v27 = vsub.s32 2, %v2154_v6 }
 0x199   : > { %1713 = vmatprep.subr.bf16.mxu0 %v1891_v55  ;;  %v1146_v0 = vor.u32 %v1145_v58, %v1142_v57  ;;  %v1924_v50 = vld [vmem:[#allocation3 + $0x218] sm:$0xff]   ;;  %v1926_v52 = vld [vmem:[#allocation3 + $0x220] sm:$0xff]   ;;  %v1927_v53 = vld [vmem:[#allocation3 + $0x268] sm:$0xff]  }
 0x19a   : > { %903 = vmatprep.mubr.bf16.mxu1 %v772_v59  ;;  %v1138_v47 = vor.u32 %v1137_v45, %v1134_v44  ;;  %v1928_v54 = vld [vmem:[#allocation3 + $0x228] sm:$0xff]   ;;  %v1929_v55 = vld [vmem:[#allocation3 + $0x270] sm:$0xff]   ;;  %v1931_v57 = vld [vmem:[#allocation3 + $0x278] sm:$0xff]  }
 0x19b   : > { %904 = vmatmul.mubr.bf16.vlgmr.msra.gmra.mrb[4].mxu1 %v765_v61  ;;  %v1930_v56 = vld [vmem:[#allocation3 + $0x230] sm:$0xff]   ;;  %v1286_v58 = vld [vmem:[#allocation2] sm:$0xf0] }
 0x19c   : > { %1732 = vmatpush3.bf16.msra.mxu1 %v1890_v60  ;;  %1277 = vmatprep.mubr.bf16.mxu1 %v1146_v0  ;;  %v1288_v59 = vld [vmem:[#allocation2 + $0x10] sm:$0xf]  ;;  %v1932_v60 = vld [vmem:[#allocation3 + $0x238] sm:$0xff]  }
 0x19d   : > { %1714 = vmatpush3.bf16.msra.mxu0 %v1892_v62  ;;  %1733 = vmatprep.subr.bf16.mxu1 %v1893_v63  ;;  %v1290_v61 = vpack.c.bf16 %v1288_v59, %v1286_v58 }
 0x19e   : > { %1715 = vmatprep.subr.bf16.mxu0 %v1895_v1 }
 0x19f   : > { %v1326_v62 = vrot.slane %v1290_v61, 2 }
 0x1a0   : > { %1734 = vmatpush3.bf16.msra.mxu1 %v1894_v2 }
 0x1a1   : > { %1716 = vmatpush3.bf16.msra.mxu0 %v1896_v3  ;;  %1735 = vmatprep.subr.bf16.mxu1 %v1897_v4  ;;  %v1588_v4 = vld [vmem:[%s2185_s4] ss:$0 sm:$0xff] }
 0x1a2   : > { %1717 = vmatprep.subr.bf16.mxu0 %v1899_v5 }
 0x1a4   : > { %1736 = vmatpush3.bf16.msra.mxu1 %v1898_v7 }
 0x1a5   : > { %1718 = vmatpush3.bf16.msra.mxu0 %v1900_v9  ;;  %1737 = vmatprep.subr.bf16.mxu1 %v1901_v10 }
 0x1a6   : > { %1719 = vmatprep.subr.bf16.mxu0 %v1903_v11 }
 0x1a8   : > { %1738 = vmatpush3.bf16.msra.mxu1 %v1902_v12 }
 0x1a9   : > { %1720 = vmatpush3.bf16.msra.mxu0 %v1904_v14  ;;  %1739 = vmatprep.subr.bf16.mxu1 %v1905_v15 }
 0x1aa   : > { %1721 = vmatprep.subr.bf16.mxu0 %v1907_v16 }
 0x1ac   : > { %1740 = vmatpush3.bf16.msra.mxu1 %v1906_v17 }
 0x1ad   : > { %1722 = vmatpush3.bf16.msra.mxu0 %v1908_v18  ;;  %1741 = vmatprep.subr.bf16.mxu1 %v1909_v19 }
 0x1ae   : > { %1723 = vmatprep.subr.bf16.mxu0 %v1911_v20 }
 0x1b0   : > { %1742 = vmatpush3.bf16.msra.mxu1 %v1910_v25 }
 0x1b1   : > { %1724 = vmatpush3.bf16.msra.mxu0 %v1912_v28  ;;  %1743 = vmatprep.subr.bf16.mxu1 %v1913_v29  ;;  %v305_v28 = vrot.slane %v2160_v8, %v304_v27 }
 0x1b2   : > { %1753 = vmatprep.subr.bf16.mxu0 %v1915_v32 }
 0x1b3   : > { %v513_v29 = vadd.f32 %v2165_v13, %v305_v28 }
 0x1b4   : > { %1744 = vmatpush3.bf16.msra.mxu1 %v1914_v34  ;;  %1085 = vmatmul.mubr.bf16.vlgmr.msra.gmra.mrb[8].mxu0 %v952_v38 }
 0x1b5   : > { %1754 = vmatpush3.bf16.msra.mxu0 %v1916_v35  ;;  %1458 = vmatprep.mubr.bf16.mxu0 %v1327_v41  ;;  %v523_v35 = vmul.f32 0.01, %v513_v29  ;;  %vm520_vm4 = vcmp.ge.f32.partialorder %v513_v29, 0.0 }
 0x1b6   : > { %1745 = vmatprep.subr.bf16.mxu1 %v1917_v39  ;;  %1755 = vmatprep.subr.bf16.mxu0 %v1919_v40 }
 0x1b7   : > { %v526_v6 = vsel %vm520_vm4, %v513_v29, %v523_v35 }
 0x1b8   : > { %1746 = vmatpush3.bf16.msra.mxu1 %v1918_v42 }
 0x1b9   : > { %1756 = vmatpush3.bf16.msra.mxu0 %v1920_v43 }
 0x1ba   : > { %1757 = vmatprep.subr.bf16.mxu0 %v1921_v46 }
 0x1bb   : > { %1278 = vmatmul.mubr.bf16.vlgmr.msra.gmra.mrb[8].mxu1 %v1138_v47 }
 0x1bd   : > { %1758 = vmatpush3.bf16.msra.mxu0 %v1922_v48 }
 0x1be   : > { %1759 = vmatprep.subr.bf16.mxu0 %v1923_v49 }
 0x1c1   : > { %1760 = vmatpush3.bf16.msra.mxu0 %v1924_v50 }
 0x1c2   : > { %1761 = vmatprep.subr.bf16.mxu0 %v1925_v51 }
 0x1c5   : > { %1762 = vmatpush3.bf16.msra.mxu0 %v1926_v52 }
 0x1c6   : > { %1763 = vmatprep.subr.bf16.mxu0 %v1927_v53 }
 0x1c9   : > { %1764 = vmatpush3.bf16.msra.mxu0 %v1928_v54 }
 0x1ca   : > { %1765 = vmatprep.subr.bf16.mxu0 %v1929_v55 }
 0x1cd   : > { %1766 = vmatpush3.bf16.msra.mxu0 %v1930_v56 }
 0x1ce   : > { %1767 = vmatprep.subr.bf16.mxu0 %v1931_v57 }
 0x1d1   : > { %1768 = vmatpush3.bf16.msra.mxu0 %v1932_v60 }
 0x1d4   : > { %1459 = vmatmul.mubr.bf16.vlgmr.msra.gmra.mrb[12].mxu0 %v1326_v62 }
 0x266   : > { %v1681_v63 = vpop.f32.mrb[4].mxu0 }
 0x267   : > { %v1682_v0 = vpop.f32.mrb[5].mxu0 }
 0x268   : > { %v1683_v1 = vadd.f32 %v1682_v0, %v1681_v63  ;;  %v1684_v2 = vpop.f32.mrb[6].mxu0 }
 0x269   : > { %v1685_v3 = vpop.f32.mrb[7].mxu0 }
 0x26a   : > { %v720_v9 = vadd.f32 %v1683_v1, %v1588_v4 }
 0x26e   : > { %v1703_v5 = vpop.f32.mrb[4].mxu1 }
 0x26f   : > { %v1704_v7 = vpop.f32.mrb[5].mxu1 }
 0x270   : > { %v1705_v10 = vadd.f32 %v1704_v7, %v1703_v5  ;;  %v1706_v11 = vpop.f32.mrb[6].mxu1 }
 0x271   : > { %v1707_v12 = vpop.f32.mrb[7].mxu1 }
 0x272   : > { %v911_v14 = vadd.f32 %v1705_v10, %v720_v9 }
 0x287   : > { %v1725_v15 = vpop.f32.mrb[8].mxu0 }
 0x288   : > { %v1726_v16 = vpop.f32.mrb[9].mxu0 }
 0x289   : > { %v1727_v17 = vadd.f32 %v1726_v16, %v1725_v15  ;;  %v1728_v18 = vpop.f32.mrb[10].mxu0 }
 0x28a   : > { %v1729_v19 = vpop.f32.mrb[11].mxu0 }
 0x28b   : > { %v1092_v20 = vadd.f32 %v1727_v17, %v911_v14 }
 0x28e   : > { %v1747_v21 = vpop.f32.mrb[8].mxu1 }
 0x28f   : > { %v1748_v22 = vpop.f32.mrb[9].mxu1 }
 0x290   : > { %v1749_v23 = vadd.f32 %v1748_v22, %v1747_v21  ;;  %v1750_v24 = vpop.f32.mrb[10].mxu1 }
 0x291   : > { %v1751_v25 = vpop.f32.mrb[11].mxu1 }
 0x292   : > { %v1285_v26 = vadd.f32 %v1749_v23, %v1092_v20 }
 0x2a7   : > { %v1769_v30 = vpop.f32.mrb[12].mxu0 }
 0x2a8   : > { %v1770_v31 = vpop.f32.mrb[13].mxu0 }
 0x2a9   : > { %v1771_v32 = vadd.f32 %v1770_v31, %v1769_v30  ;;  %v1772_v33 = vpop.f32.mrb[14].mxu0 }
 0x2aa   : > { %v1773_v34 = vpop.f32.mrb[15].mxu0 }
 0x2ab   : > { %v1466_v36 = vadd.f32 %v1771_v32, %v1285_v26 }
 0x2ad   : > { %vm1467_vm5 = vcmp.ge.f32.partialorder %v1466_v36, 0.0  ;;  %v1468_v37 = vmul.f32 0.01, %v1466_v36 }
 0x2af   : > { %v1469_v38 = vsel %vm1467_vm5, %v1466_v36, %v1468_v37 }
 0x2b0   : > { %v1470_v8 = vadd.f32 %v1469_v38, %v526_v6 }
 0x2b2   : > { %1471 = vst [vmem:[%s237_s28] sm:$0xff] %v1470_v8 }
 0x2b3 PF: > { %s16_s18 = sadd.s32 1, %s1971_s18  }
 0x2b4   : > { %p13_p3 = scmp.ge.s32.totalorder %s16_s18, 4  }
 0x2b6   :  { %15 = sbr.rel (!%p13_p3) target bundleno = 1 (0x1), region = 75 }
 0x2bd   :  { %1491 = vsyncpa [#allocation4], 1 }
 0x2be   :  { %1493 = vsyncpa [#allocation4 + $0x1], 1 }

</bundles_post_ra>
